<compile_context>
chip_gen: v7x
topology: tpu7x:2x2x1
jax: 0.10.0
libtpu: 0.0.40
codegen_flags: <defaults>
</compile_context>

<pallas_src>
import math

import jax
import jax.numpy as jnp
from jax.experimental import pallas as pl
from jax.experimental.pallas import tpu as pltpu


# ---------------------------------------------------------------------------
# DCT transform matrices (built once in the wrapper, tiny)
# ---------------------------------------------------------------------------
def dct_matrix(k, dtype=jnp.float32):
    """A[i, j] = sqrt(1/k) * cos((j+0.5) pi i / k) for i == 0, sqrt(2/k)*... otherwise."""
    i = jnp.arange(k, dtype=jnp.float32)[:, None]
    j = jnp.arange(k, dtype=jnp.float32)[None, :]
    a = jnp.cos((j + 0.5) * jnp.pi * i / k)
    scale = jnp.where(i == 0, jnp.sqrt(1.0 / k), jnp.sqrt(2.0 / k))
    return (scale * a).astype(dtype)


def block_diag_dct(size, kernel_size, dtype=jnp.float32):
    """Block-diagonal (size x size) matrix with the KxK DCT matrix on the diagonal."""
    a = dct_matrix(kernel_size, dtype)
    nb = size // kernel_size
    return jnp.kron(jnp.eye(nb, dtype=dtype), a)


# ---------------------------------------------------------------------------
# Kernel: one (M, H) slab  ->  D_left @ slab @ D_H^T  (two plain 2D matmuls)
# ---------------------------------------------------------------------------
def dct_kernel(dl_ref, drt_ref, x_ref, o_ref):
    # Right transform: r[m, c] = sum_h x[m, h] * D_H[c, h]  (drt_ref holds D_H^T,
    # so this is a single lane-contracting 2D MXU matmul; no in-kernel transpose).
    r = jnp.dot(x_ref[...], drt_ref[...], preferred_element_type=jnp.float32)
    # Left transform: out = D_left @ r (block-diagonal D_left applies A to every
    # K-row block; batch boundaries align with W, a multiple of K, so blocks never
    # straddle batch elements).
    out = jnp.dot(dl_ref[...], r.astype(dl_ref.dtype),
                  preferred_element_type=jnp.float32)
    o_ref[...] = out.astype(o_ref.dtype)


# ---------------------------------------------------------------------------
# Wrapper
# ---------------------------------------------------------------------------
def _choose_group(n, w, rows_target):
    """How many batch elements to fold into the slab M-dim per grid step."""
    step = 8 // math.gcd(w, 8)            # smallest g keeping (g*W) % 8 == 0
    g = max(1, rows_target // w)
    g = max(step, (g // step) * step)
    g = min(g, -(-n // step) * step)      # no point exceeding (padded) batch
    # v7x has 2 TensorCores: keep the "parallel" batch grid >= 2 steps if possible.
    if -(-n // g) < 2 and n > step:
        g_half = -(-n // 2)
        g = max(step, -(-g_half // step) * step)
    return g


def dct_pallas(x, kernel_size, rows_target=512):
    x_shape = x.shape
    W, H = x_shape[-2], x_shape[-1]
    assert W % kernel_size == 0 and H % kernel_size == 0, \
        "W and H must be divisible by kernel_size"

    n = math.prod(x_shape[:-2]) if len(x_shape) > 2 else 1
    dtype = x.dtype
    itemsize = jnp.dtype(dtype).itemsize

    g = _choose_group(n, W, rows_target)
    n_pad = (-n) % g
    xf = x.reshape(n, W, H)
    if n_pad:
        xf = jnp.concatenate([xf, jnp.zeros((n_pad, W, H), dtype)], axis=0)
    n_total = n + n_pad
    n_groups = n_total // g
    M = g * W                                   # slab rows per grid step

    # Fold batch into the matmul M dimension (contiguous, zero-cost reshape).
    slab = xf.reshape(n_total * W, H)

    # Transform matrices: D_left = kron(I_{M/K}, A) (M x M), D_H^T (H x H).
    dl = block_diag_dct(M, kernel_size, dtype)
    drt = block_diag_dct(H, kernel_size, dtype).T

    # Scheduling / VMEM hints.
    flops = 2 * n_groups * (M * M * H + M * H * H)
    bytes_accessed = (2 * n_total * W * H + M * M + H * H) * itemsize
    vmem_est = 2 * (2 * M * H + M * M + H * H) * itemsize + (2 << 20)
    vmem_limit = int(min(max(vmem_est, 16 << 20), 64 << 20))

    out = pl.pallas_call(
        dct_kernel,
        out_shape=jax.ShapeDtypeStruct((n_total * W, H), dtype),
        grid_spec=pltpu.PrefetchScalarGridSpec(
            num_scalar_prefetch=0,
            grid=(n_groups,),
            in_specs=[
                pl.BlockSpec((M, M), lambda i: (0, 0)),   # D_left, VMEM-resident
                pl.BlockSpec((H, H), lambda i: (0, 0)),   # D_H^T, VMEM-resident
                pl.BlockSpec((M, H), lambda i: (i, 0)),   # input slab
            ],
            out_specs=pl.BlockSpec((M, H), lambda i: (i, 0)),
        ),
        compiler_params=pltpu.CompilerParams(
            dimension_semantics=("parallel",),
            vmem_limit_bytes=vmem_limit,
        ),
        cost_estimate=pl.CostEstimate(
            flops=flops, transcendentals=0, bytes_accessed=bytes_accessed),
    )(dl, drt, slab)

    out = out.reshape(n_total, W, H)[:n]
    return out.reshape(x_shape)


# ---------------------------------------------------------------------------
# Pure-JAX reference that mirrors the PyTorch forward (per-block loop)
# ---------------------------------------------------------------------------
def dct_reference(x, kernel_size):
    a = dct_matrix(kernel_size, x.dtype)
    xs = x.shape
    xf = x.reshape(-1, xs[-2], xs[-1])
    ret = jnp.zeros_like(xf)
    k = kernel_size
    for i in range(0, xs[-2], k):
        for j in range(0, xs[-1], k):
            blk = xf[:, i:i + k, j:j + k]
            out = jnp.einsum('ab,nbc,dc->nad', a, blk, a)   # A @ blk @ A^T
            ret = ret.at[:, i:i + k, j:j + k].set(out)
    return ret.reshape(xs)


# ---------------------------------------------------------------------------
if __name__ == "__main__":
    key = jax.random.PRNGKey(0)
    k1, k2 = jax.random.split(key)

    # Test 1: [*, W, H] = [2, 4, 16, 16], kernel_size = 4
    x1 = jax.random.normal(k1, (2, 4, 16, 16), jnp.float32)
    y1 = jax.block_until_ready(dct_pallas(x1, kernel_size=4))
    ref1 = dct_reference(x1, kernel_size=4)
    assert y1.shape == x1.shape
    assert bool(jnp.all(jnp.isfinite(y1)))
    assert bool(jnp.max(jnp.abs(y1 - ref1)) < 1e-3), float(jnp.max(jnp.abs(y1 - ref1)))

    # Test 2: non-square spatial dims + odd batch grouping (N=6 -> g=3, 2 grid steps)
    x2 = jax.random.normal(k2, (2, 3, 8, 16), jnp.float32)
    y2 = jax.block_until_ready(dct_pallas(x2, kernel_size=8))
    ref2 = dct_reference(x2, kernel_size=8)
    assert y2.shape == x2.shape
    assert bool(jnp.max(jnp.abs(y2 - ref2)) < 1e-3), float(jnp.max(jnp.abs(y2 - ref2)))

    print("KERNEL_OK")
</pallas_src>

<mosaic_0001>
module attributes {stable_mosaic.version = 11 : i64} {
  func.func @dct_kernel(%arg0: i32, %arg1: memref<64x64xf32, #tpu.memory_space<vmem>>, %arg2: memref<16x16xf32, #tpu.memory_space<vmem>>, %arg3: memref<64x16xf32, #tpu.memory_space<vmem>>, %arg4: memref<64x16xf32, #tpu.memory_space<vmem>>) attributes {dimension_semantics = [#tpu.dimension_semantics<parallel>], iteration_bounds = array<i64: 2>, scalar_prefetch = 0 : i64, scratch_operands = 0 : i64, tpu.core_type = #tpu.core_type<tc>, window_params = [{pipeline_mode = #tpu.pipeline_mode<synchronous>, transform_indices = @transform_0, window_bounds = array<i64: 64, 64>}, {pipeline_mode = #tpu.pipeline_mode<synchronous>, transform_indices = @transform_1, window_bounds = array<i64: 16, 16>}, {transform_indices = @transform_2, window_bounds = array<i64: 64, 16>}, {transform_indices = @transform_3, window_bounds = array<i64: 64, 16>}]} {
    %c0 = arith.constant 0 : index
    %c0_0 = arith.constant 0 : index
    %0 = vector.load %arg3[%c0, %c0_0] : memref<64x16xf32, #tpu.memory_space<vmem>>, vector<64x16xf32>
    %c0_1 = arith.constant 0 : index
    %c0_2 = arith.constant 0 : index
    %1 = vector.load %arg2[%c0_1, %c0_2] : memref<16x16xf32, #tpu.memory_space<vmem>>, vector<16x16xf32>
    %cst = arith.constant dense<0.000000e+00> : vector<64x16xf32>
    %2 = tpu.matmul %0, %1, %cst {dimension_numbers = #tpu.dot_dimension_numbers<[1], [0], [0], [1], [0, 0, 1, 1], [], []>} : vector<64x16xf32>, vector<16x16xf32>, vector<64x16xf32> -> vector<64x16xf32>
    %c0_3 = arith.constant 0 : index
    %c0_4 = arith.constant 0 : index
    %3 = vector.load %arg1[%c0_3, %c0_4] : memref<64x64xf32, #tpu.memory_space<vmem>>, vector<64x64xf32>
    %cst_5 = arith.constant dense<0.000000e+00> : vector<64x16xf32>
    %4 = tpu.matmul %3, %2, %cst_5 {dimension_numbers = #tpu.dot_dimension_numbers<[1], [0], [0], [1], [0, 0, 1, 1], [], []>} : vector<64x64xf32>, vector<64x16xf32>, vector<64x16xf32> -> vector<64x16xf32>
    %c0_6 = arith.constant 0 : index
    %c0_7 = arith.constant 0 : index
    %5 = vector.load %arg4[%c0_6, %c0_7] : memref<64x16xf32, #tpu.memory_space<vmem>>, vector<64x16xf32>
    tpu.vector_store %arg4[%c0_6, %c0_7], %4 {strides = array<i32>} : memref<64x16xf32, #tpu.memory_space<vmem>>, vector<64x16xf32>,
    return
  }
  func.func @transform_0(%arg0: i32) -> (i32, i32) {
    %c0_i32 = arith.constant 0 : i32
    %c0_i32_0 = arith.constant 0 : i32
    %c0_i32_1 = arith.constant 0 : i32
    return %c0_i32, %c0_i32_0 : i32, i32
  }
  func.func @transform_1(%arg0: i32) -> (i32, i32) {
    %c0_i32 = arith.constant 0 : i32
    %c0_i32_0 = arith.constant 0 : i32
    %c0_i32_1 = arith.constant 0 : i32
    return %c0_i32, %c0_i32_0 : i32, i32
  }
  func.func @transform_2(%arg0: i32) -> (i32, i32) {
    %c0_i32 = arith.constant 0 : i32
    %c0_i32_0 = arith.constant 0 : i32
    return %arg0, %c0_i32 : i32, i32
  }
  func.func @transform_3(%arg0: i32) -> (i32, i32) {
    %c0_i32 = arith.constant 0 : i32
    %c0_i32_0 = arith.constant 0 : i32
    return %arg0, %c0_i32 : i32, i32
  }
}

</mosaic_0001>

<bundles_post_ra>
// kernel: tpu_custom_call.1
= control target key start
LH: loop header
LB: loop body
LE: loop exit
PB: predicated region body
PF: predicated region fallthrough
CT: control target
= control target key end

     0   :  { %s677_s12 = smov 0   ;;  %s755_s0 = inlined_call_operand.vmem [shape: f32[64,64], index: 0, kind: input, shape index: {}]   ;;  %s756_s1 = inlined_call_operand.vmem [shape: f32[16,16], index: 1, kind: input, shape index: {}]   ;;  %s757_s2 = inlined_call_operand.vmem [shape: f32[128,16], index: 2, kind: input, shape index: {}]   ;;  %s758_s3 = inlined_call_operand.vmem [shape: f32[128,16], index: 3, kind: output, shape index: {}]  }
   0x1 LB: > { %s516_s13 = sadd.s32 4294967295, %s655_s12   ;;  %p520_p0 = scmp.ge.s32.totalorder %s655_s12, 1  ;;  %s655_s12 = sphi %s677_s12, %s13_s12  }
   0x2   : > { %p138_p1 = scmp.lt.s32.totalorder %s655_s12, 3 }
   0x4   : > { %p139_p2 = pnand %p520_p0, %p138_p1 }
   0x5   : > { %v182_v0 = vld [vmem:[%s756_s1] sm:$0xff] (!%p139_p2)  ;;  %v183_v1 = vld [vmem:[%s756_s1 + $0x8] sm:$0xff] (!%p139_p2)  ;;  %s521_s18 = sshll.u32 (!%p139_p2), %s516_s13, 3  ;;  %vm184_vm0 = vcmask (!%p139_p2), 130048   ;;  %v316_v11 = vld [vmem:[%s755_s0 + $0x10] sm:$0xff] (!%p139_p2)  ;;  %vm322_vm1 = vcmask (!%p139_p2), 523264  }
   0x6   : > { %142 = sbr.rel (%p139_p2) target bundleno = 471 (0x1d7), region = 32  ;;  %v613_v2 = vpack.c.bf16 (!%p139_p2), %v183_v1, %v182_v0  ;;  %p163_p3 = scmp.lt.s32.totalorder (!%p139_p2), %s521_s18, 15  ;;  %604 = vmatprep.mubr.msk.f32.mxu1 (!%p139_p2), %vm322_vm1, %v316_v11  ;;  %v314_v12 = vld [vmem:[%s755_s0] sm:$0xff] (!%p139_p2)  ;;  %v317_v25 = vld [vmem:[%s755_s0 + $0x18] sm:$0xff] (!%p139_p2)  ;;  %v315_v26 = vld [vmem:[%s755_s0 + $0x8] sm:$0xff] (!%p139_p2) }
   0x7   : > { %v318_v27 = vld [vmem:[%s755_s0 + $0x20] sm:$0xff] (!%p139_p2)  ;;  %v319_v28 = vld [vmem:[%s755_s0 + $0x28] sm:$0xff] (!%p139_p2)  ;;  %v320_v29 = vld [vmem:[%s755_s0 + $0x30] sm:$0xff] (!%p139_p2) }
   0x8   : > { %614 = vmatprep.subr.bf16.mxu0 (!%p139_p2), %v613_v2  ;;  %v321_v30 = vld [vmem:[%s755_s0 + $0x38] sm:$0xff] (!%p139_p2) }
   0x9   : > { %616 = vmatpush3.bf16.msra.mxu0 (!%p139_p2), %v613_v2 }
   0xd   : > { %s760_s18 = smov (!%p163_p3, %s521_s18), 15 }
   0xe   : > { %s522_s19 = sshll.u32 %s760_s18, 3 }
   0xf   : > { %s166_s22 = scalar_lea.vmem %s757_s2, %s522_s19  ;;  %s172_s15 = scalar_lea.vmem %s758_s3, %s522_s19 }
  0x10   : > { %v174_v3 = vld [vmem:[%s166_s22] sm:$0xff]  ;;  %v175_v4 = vld [vmem:[%s166_s22 + $0x8] sm:$0xff]  ;;  %v176_v5 = vld [vmem:[%s166_s22 + $0x10] sm:$0xff] }
  0x11   : > { %573 = vmatprep.mubr.msk.f32.mxu0 %vm184_vm0, %v174_v3  ;;  %v177_v6 = vld [vmem:[%s166_s22 + $0x18] sm:$0xff]  ;;  %v178_v7 = vld [vmem:[%s166_s22 + $0x20] sm:$0xff]  ;;  %v179_v8 = vld [vmem:[%s166_s22 + $0x28] sm:$0xff] }
  0x12   : > { %574 = vmatmul.mubr.msk.f32.vlgmr.msra.gmra.mrb[0].mxu0 %vm184_vm0, %v175_v4  ;;  %v180_v9 = vld [vmem:[%s166_s22 + $0x30] sm:$0xff]  ;;  %v181_v10 = vld [vmem:[%s166_s22 + $0x38] sm:$0xff] }
  0x13   : > { %576 = vmatprep.mubr.msk.f32.mxu0 %vm184_vm0, %v176_v5 }
  0x16   : > { %577 = vmatmul.mubr.msk.f32.gmra.mrb[2].mxu0 %vm184_vm0, %v177_v6 }
  0x17   : > { %579 = vmatprep.mubr.msk.f32.mxu0 %vm184_vm0, %v178_v7 }
  0x1a   : > { %580 = vmatmul.mubr.msk.f32.gmra.mrb[4].mxu0 %vm184_vm0, %v179_v8 }
  0x1b   : > { %582 = vmatprep.mubr.msk.f32.mxu0 %vm184_vm0, %v180_v9 }
  0x1e   : > { %583 = vmatmul.mubr.msk.f32.gmra.mrb[6].mxu0 %vm184_vm0, %v181_v10 }
  0x1f   : > { %601 = vmatprep.mubr.msk.f32.mxu0 %vm322_vm1, %v314_v12 }
  0xe5   : > { %v575_v13 = vpop.f32.mrb[0].mxu0 }
  0xe6   : > { %v275_v14 = vpop.f32.mrb[1].mxu0 }
  0xe7   : > { %v617_v15 = vpack.c.bf16 %v575_v13, %v275_v14 }
  0xe9   : > { %v578_v16 = vpop.f32.mrb[2].mxu0  ;;  %618 = vmatprep.subr.bf16.mxu0 %v617_v15  ;;  %633 = vmatprep.subr.bf16.mxu1 %v617_v15 }
  0xea   : > { %v285_v17 = vpop.f32.mrb[3].mxu0  ;;  %620 = vmatpush3.bf16.msra.mxu0 %v617_v15  ;;  %637 = vmatpush3.bf16.msra.mxu1 %v617_v15 }
  0xeb   : > { %v621_v18 = vpack.c.bf16 %v578_v16, %v285_v17 }
  0xed   : > { %v581_v19 = vpop.f32.mrb[4].mxu0  ;;  %622 = vmatprep.subr.bf16.mxu0 %v621_v18  ;;  %634 = vmatprep.subr.bf16.mxu1 %v621_v18 }
  0xee   : > { %v295_v20 = vpop.f32.mrb[5].mxu0  ;;  %624 = vmatpush3.bf16.msra.mxu0 %v621_v18  ;;  %638 = vmatpush3.bf16.msra.mxu1 %v621_v18 }
  0xef   : > { %v625_v21 = vpack.c.bf16 %v581_v19, %v295_v20 }
  0xf1   : > { %v584_v22 = vpop.f32.mrb[6].mxu0  ;;  %626 = vmatprep.subr.bf16.mxu0 %v625_v21  ;;  %635 = vmatprep.subr.bf16.mxu1 %v625_v21 }
  0xf2   : > { %v305_v23 = vpop.f32.mrb[7].mxu0  ;;  %628 = vmatpush3.bf16.msra.mxu0 %v625_v21  ;;  %639 = vmatpush3.bf16.msra.mxu1 %v625_v21 }
  0xf3   : > { %v629_v24 = vpack.c.bf16 %v584_v22, %v305_v23 }
  0xf5   : > { %630 = vmatprep.subr.bf16.mxu0 %v629_v24  ;;  %636 = vmatprep.subr.bf16.mxu1 %v629_v24 }
  0xf6   : > { %632 = vmatpush3.bf16.msra.mxu0 %v629_v24  ;;  %640 = vmatpush3.bf16.msra.mxu1 %v629_v24 }
  0xf9   : > { %605 = vmatmul.mubr.msk.f32.vlgmr.msra.gmra.mrb[0].mxu1 %vm322_vm1, %v317_v25  ;;  %602 = vmatmul.mubr.msk.f32.vlgmr.msra.gmra.mrb[8].mxu0 %vm322_vm1, %v315_v26 }
  0xfa   : > { %607 = vmatprep.mubr.msk.f32.mxu1 %vm322_vm1, %v318_v27 }
  0xfd   : > { %608 = vmatmul.mubr.msk.f32.gmra.mrb[2].mxu1 %vm322_vm1, %v319_v28 }
  0xfe   : > { %610 = vmatprep.mubr.msk.f32.mxu1 %vm322_vm1, %v320_v29 }
 0x101   : > { %611 = vmatmul.mubr.msk.f32.gmra.mrb[4].mxu1 %vm322_vm1, %v321_v30 }
 0x1cc   : > { %v606_v31 = vpop.f32.mrb[0].mxu1  ;;  %v603_v32 = vpop.f32.mrb[8].mxu0 }
 0x1cd   : > { %455 = vst.msk [vmem:[%s172_s15 + $0x18] sm:$0xff] %vm184_vm0, %v606_v31  ;;  %v423_v33 = vpop.f32.mrb[1].mxu1  ;;  %453 = vst.msk [vmem:[%s172_s15 + $0x8] sm:$0xff] %vm184_vm0, %v603_v32  ;;  %v413_v34 = vpop.f32.mrb[9].mxu0 }
 0x1ce   : > { %454 = vst.msk [vmem:[%s172_s15 + $0x10] sm:$0xff] %vm184_vm0, %v423_v33  ;;  %452 = vst.msk [vmem:[%s172_s15] sm:$0xff] %vm184_vm0, %v413_v34 }
 0x1d0   : > { %v609_v35 = vpop.f32.mrb[2].mxu1 }
 0x1d1   : > { %457 = vst.msk [vmem:[%s172_s15 + $0x28] sm:$0xff] %vm184_vm0, %v609_v35  ;;  %v433_v36 = vpop.f32.mrb[3].mxu1 }
 0x1d2   : > { %456 = vst.msk [vmem:[%s172_s15 + $0x20] sm:$0xff] %vm184_vm0, %v433_v36 }
 0x1d4   : > { %v612_v37 = vpop.f32.mrb[4].mxu1 }
 0x1d5   : > { %459 = vst.msk [vmem:[%s172_s15 + $0x38] sm:$0xff] %vm184_vm0, %v612_v37  ;;  %v443_v38 = vpop.f32.mrb[5].mxu1 }
 0x1d6   : > { %458 = vst.msk [vmem:[%s172_s15 + $0x30] sm:$0xff] %vm184_vm0, %v443_v38 }
 0x1d7 PF: > { %s13_s12 = sadd.s32 1, %s655_s12  }
 0x1d8   : > { %p10_p4 = scmp.ge.s32.totalorder %s13_s12, 4  }
 0x1da   :  { %12 = sbr.rel (!%p10_p4) target bundleno = 1 (0x1), region = 62 }

</bundles_post_ra>
